<compile_context>
chip_gen: v5e
topology: v5e:2x2
jax: 0.10.0
libtpu: 0.0.40
codegen_flags: <defaults>
</compile_context>

<pallas_src>
import functools

import jax
import jax.numpy as jnp
from jax.experimental import pallas as pl
from jax.experimental.pallas import tpu as pltpu

_LANE = 128
_SUBLANE = 8


def _round_up(x, m):
    return (x + m - 1) // m * m


def _vmem_cap_bytes():
    """Physical per-core VMEM; falls back to 64 MiB (the smallest across v5e/v6e/v7x)."""
    try:
        return int(pltpu.get_tpu_info().vmem_capacity_bytes)
    except Exception:
        return 64 * 1024 * 1024


@functools.lru_cache(maxsize=None)
def _buffered1_supported():
    """One-time probe: does this Pallas build accept pipeline_mode=pl.Buffered(1)?

    The probe is isolated from the real kernel, so a broad except here only disables
    the single-buffering optimization (it can never mask a real VMEM OOM / user error).
    """
    if not hasattr(pl, "Buffered"):
        return False

    def k(a_ref, b_ref, o_ref):
        o_ref[...] = a_ref[...] + b_ref[...]

    try:
        f = pl.pallas_call(
            k,
            out_shape=jax.ShapeDtypeStruct((2 * _SUBLANE, _LANE), jnp.float32),
            grid_spec=pltpu.PrefetchScalarGridSpec(
                num_scalar_prefetch=0,
                grid=(2,),
                in_specs=[
                    pl.BlockSpec((_SUBLANE, _LANE), lambda i: (i, 0)),
                    pl.BlockSpec((_SUBLANE, _LANE), lambda i: (0, 0),
                                 pipeline_mode=pl.Buffered(1)),
                ],
                out_specs=pl.BlockSpec((_SUBLANE, _LANE), lambda i: (i, 0)),
            ),
        )
        jax.block_until_ready(
            f(jnp.zeros((2 * _SUBLANE, _LANE), jnp.float32),
              jnp.zeros((_SUBLANE, _LANE), jnp.float32)))
        return True
    except Exception:
        return False


def mlp_kernel(x_ref, w1_ref, b1_ref, w2_ref, b2_ref, w3_ref, b3_ref, o_ref, *, gelu_approx):
    # MXU operands carry the weights' dtype (f32 or bf16, set once in prepare_params);
    # accumulation, bias add and GELU are always f32 (VPU/EUP work stays f32 for v5e).
    cdt = w1_ref.dtype

    x = x_ref[...]
    h = jnp.dot(x, w1_ref[...], preferred_element_type=jnp.float32) + b1_ref[...]
    h = jax.nn.gelu(h, approximate=gelu_approx)

    h = jnp.dot(h.astype(cdt), w2_ref[...], preferred_element_type=jnp.float32) + b2_ref[...]
    h = jax.nn.gelu(h, approximate=gelu_approx)

    out = jnp.dot(h.astype(cdt), w3_ref[...], preferred_element_type=jnp.float32) + b3_ref[...]
    o_ref[...] = out.astype(o_ref.dtype)


def prepare_params(params, compute_dtype=jnp.bfloat16):
    """One-time weight prep: pad feature dims up to multiples of 128 (lane-dense) and
    cast MXU operands to `compute_dtype`.  Biases stay f32.  Zero-padding is exact:
    padded x columns and padded weight rows are 0, gelu(0)=0."""
    cdt = jnp.dtype(compute_dtype)
    dim, hid = params["w1"].shape
    out_dim = params["w3"].shape[1]
    din_p = _round_up(dim, _LANE)
    dhid_p = _round_up(hid, _LANE)
    dout_p = _round_up(out_dim, _LANE)

    def pad2(a, rows, cols, dtype):
        a = a.astype(dtype)
        return jnp.pad(a, ((0, rows - a.shape[0]), (0, cols - a.shape[1])))

    return {
        "w1": pad2(params["w1"], din_p, dhid_p, cdt),
        "b1": pad2(params["b1"], 1, dhid_p, jnp.float32),
        "w2": pad2(params["w2"], dhid_p, dhid_p, cdt),
        "b2": pad2(params["b2"], 1, dhid_p, jnp.float32),
        "w3": pad2(params["w3"], dhid_p, dout_p, cdt),
        "b3": pad2(params["b3"], 1, dout_p, jnp.float32),
    }


@functools.partial(jax.jit, static_argnames=("out_dim", "tm", "gelu_approx", "single_buf"))
def _mlp_forward_jit(x, prepared, *, out_dim, tm, gelu_approx, single_buf):
    N, dim = x.shape
    w1, w2, w3 = prepared["w1"], prepared["w2"], prepared["w3"]
    b1, b2, b3 = prepared["b1"], prepared["b2"], prepared["b3"]
    din_p, dhid_p = w1.shape
    dout_p = w3.shape[1]
    cdt = w1.dtype
    out_dtype = x.dtype
    assert dim <= din_p and out_dim <= dout_p, "prepared params do not match input/output dims"

    # Column (lane) zero-padding of x only -- required for exactness of the K reduction.
    # No row padding: partial last row tile is handled by Pallas block masking.
    if dim != din_p or x.dtype != cdt:
        xp = jnp.pad(x, ((0, 0), (0, din_p - dim))).astype(cdt)
    else:
        xp = x

    # Row tile: large to amortize the ~0.35us/step pipeline overhead, clamped to one
    # step for tiny N, but kept >= 2 steps for moderate N so both v7x cores get work.
    tm_eff = min(tm, _round_up(N, _SUBLANE))
    if N > 512:
        tm_eff = min(tm_eff, _round_up(pl.cdiv(N, 2), _SUBLANE))
    tm_eff = _round_up(tm_eff, _SUBLANE)
    grid_rows = pl.cdiv(N, tm_eff)

    # Computed VMEM budget (per core) with headroom, clamped to physical capacity.
    cdt_bytes = jnp.dtype(cdt).itemsize
    out_bytes = jnp.dtype(out_dtype).itemsize
    weight_bufs = 1 if single_buf else 2
    w_bytes = (din_p * dhid_p + dhid_p * dhid_p + dhid_p * dout_p) * cdt_bytes
    bias_bytes = (2 * dhid_p + dout_p) * 4
    stream_bytes = 2 * tm_eff * (din_p * cdt_bytes + dout_p * out_bytes)  # 2x-buffered x/out tiles
    interm_bytes = tm_eff * (3 * dhid_p + dout_p) * 4                      # live f32 intermediates
    budget = weight_bufs * (w_bytes + bias_bytes) + stream_bytes + interm_bytes
    budget += 8 * 1024 * 1024                                              # Mosaic scratch headroom
    cap = _vmem_cap_bytes() - (1 << 20)
    vmem_limit = int(min(cap, max(budget, 32 * 1024 * 1024)))

    def w_spec(shape):
        # Grid-invariant weights/biases: single-buffer when the build supports it.
        if single_buf:
            return pl.BlockSpec(shape, lambda i: (0, 0), pipeline_mode=pl.Buffered(1))
        return pl.BlockSpec(shape, lambda i: (0, 0))

    flops = 2 * N * (din_p * dhid_p + dhid_p * dhid_p + dhid_p * dout_p)
    transcendentals = 2 * N * dhid_p
    bytes_accessed = xp.size * cdt_bytes + w_bytes + bias_bytes + N * dout_p * out_bytes

    out = pl.pallas_call(
        functools.partial(mlp_kernel, gelu_approx=gelu_approx),
        out_shape=jax.ShapeDtypeStruct((N, dout_p), out_dtype),
        grid_spec=pltpu.PrefetchScalarGridSpec(
            num_scalar_prefetch=0,
            grid=(grid_rows,),
            in_specs=[
                pl.BlockSpec((tm_eff, din_p), lambda i: (i, 0)),   # x row tile
                w_spec((din_p, dhid_p)),                           # w1
                w_spec((1, dhid_p)),                               # b1
                w_spec((dhid_p, dhid_p)),                          # w2
                w_spec((1, dhid_p)),                               # b2
                w_spec((dhid_p, dout_p)),                          # w3
                w_spec((1, dout_p)),                               # b3
            ],
            out_specs=pl.BlockSpec((tm_eff, dout_p), lambda i: (i, 0)),
        ),
        compiler_params=pltpu.CompilerParams(
            dimension_semantics=("parallel",),
            vmem_limit_bytes=vmem_limit,
        ),
        cost_estimate=pl.CostEstimate(
            flops=flops, transcendentals=transcendentals, bytes_accessed=bytes_accessed),
    )(xp, w1, b1, w2, b2, w3, b3)

    return out[:, :out_dim]


def mlp_forward(x, prepared, out_dim, *, tm=512, gelu_approx=True):
    """x: [N, dim] float32.  prepared: output of prepare_params.  Returns [N, out_dim]."""
    return _mlp_forward_jit(x, prepared, out_dim=out_dim, tm=tm,
                            gelu_approx=gelu_approx, single_buf=_buffered1_supported())


def init_params(key, dim, out_dim, dtype=jnp.float32):
    """Deterministic synthetic parameters matching nn.Linear shapes.
    PyTorch stores weight as [out, in]; we keep them pre-transposed as [in, out]."""
    ks = jax.random.split(key, 6)
    s1 = 1.0 / jnp.sqrt(dim)
    return {
        "w1": jax.random.uniform(ks[0], (dim, dim), dtype, -s1, s1),
        "b1": jax.random.uniform(ks[1], (1, dim), dtype, -s1, s1),
        "w2": jax.random.uniform(ks[2], (dim, dim), dtype, -s1, s1),
        "b2": jax.random.uniform(ks[3], (1, dim), dtype, -s1, s1),
        "w3": jax.random.uniform(ks[4], (dim, out_dim), dtype, -s1, s1),
        "b3": jax.random.uniform(ks[5], (1, out_dim), dtype, -s1, s1),
    }


def mlp_reference(x, params, *, approx=True):
    """Pure-JAX reference of the fused stack (approx selects tanh vs exact-erf GELU)."""
    h = jax.nn.gelu(x @ params["w1"] + params["b1"], approximate=approx)
    h = jax.nn.gelu(h @ params["w2"] + params["b2"], approximate=approx)
    return h @ params["w3"] + params["b3"]


if __name__ == "__main__":
    key = jax.random.PRNGKey(0)
    k_x, k_p, k_x2, k_p2 = jax.random.split(key, 4)

    # --- Test 1: small module-consistent shapes, f32 MXU operands, single grid step.
    batch, seq, dim, out_dim = 2, 8, 32, 16
    x = jax.random.normal(k_x, (batch, seq, dim), dtype=jnp.float32)
    params = init_params(k_p, dim, out_dim)
    prep_f32 = prepare_params(params, compute_dtype=jnp.float32)   # one-time weight prep
    x2d = x.reshape(batch * seq, dim)
    out = jax.block_until_ready(mlp_forward(x2d, prep_f32, out_dim))
    ref = mlp_reference(x2d, params, approx=True)
    assert out.shape == (batch * seq, out_dim)
    assert jnp.allclose(out, ref, atol=5e-2, rtol=5e-2), "f32 small-shape mismatch"

    # --- Test 2: larger ragged shapes (partial last row tile + lane padding), f32 path.
    N2, dim2, out2 = 1000, 96, 200
    xb = jax.random.normal(k_x2, (N2, dim2), dtype=jnp.float32)
    params2 = init_params(k_p2, dim2, out2)
    prep2_f32 = prepare_params(params2, compute_dtype=jnp.float32)
    outb = jax.block_until_ready(mlp_forward(xb, prep2_f32, out2, tm=512))
    refb = mlp_reference(xb, params2, approx=True)
    assert outb.shape == (N2, out2)
    assert jnp.allclose(outb, refb, atol=5e-2, rtol=5e-2), "tiled f32 mismatch"
    # sanity vs the exact-erf (PyTorch nn.GELU default) reference
    refb_exact = mlp_reference(xb, params2, approx=False)
    assert jnp.allclose(outb, refb_exact, atol=1e-1, rtol=1e-1), "approx-GELU drift too large"

    # --- Test 3: default path (bf16 MXU operands, f32 accumulation) — mirrors the
    # module's own fp16 cast before the linears; rounding-only loose tolerance.
    prep2_bf16 = prepare_params(params2)  # bf16 by default
    outc = jax.block_until_ready(mlp_forward(xb, prep2_bf16, out2, tm=512))
    assert outc.shape == (N2, out2)
    assert jnp.allclose(outc, refb, atol=2e-1, rtol=2e-1), "bf16 mismatch"

    print("KERNEL_OK")
</pallas_src>

<mosaic_0001>
module attributes {stable_mosaic.version = 11 : i64} {
  func.func @k(%arg0: i32, %arg1: memref<8x128xf32, #tpu.memory_space<vmem>>, %arg2: memref<8x128xf32, #tpu.memory_space<vmem>>, %arg3: memref<8x128xf32, #tpu.memory_space<vmem>>) attributes {dimension_semantics = [#tpu.dimension_semantics<arbitrary>], iteration_bounds = array<i64: 2>, scalar_prefetch = 0 : i64, scratch_operands = 0 : i64, tpu.core_type = #tpu.core_type<tc>, window_params = [{transform_indices = @transform_0, window_bounds = array<i64: 8, 128>}, {pipeline_mode = #tpu.pipeline_mode<synchronous>, transform_indices = @transform_1, window_bounds = array<i64: 8, 128>}, {transform_indices = @transform_2, window_bounds = array<i64: 8, 128>}]} {
    %c0 = arith.constant 0 : index
    %c0_0 = arith.constant 0 : index
    %0 = vector.load %arg1[%c0, %c0_0] : memref<8x128xf32, #tpu.memory_space<vmem>>, vector<8x128xf32>
    %c0_1 = arith.constant 0 : index
    %c0_2 = arith.constant 0 : index
    %1 = vector.load %arg2[%c0_1, %c0_2] : memref<8x128xf32, #tpu.memory_space<vmem>>, vector<8x128xf32>
    %2 = arith.addf %0, %1 : vector<8x128xf32>
    %c0_3 = arith.constant 0 : index
    %c0_4 = arith.constant 0 : index
    %3 = vector.load %arg3[%c0_3, %c0_4] : memref<8x128xf32, #tpu.memory_space<vmem>>, vector<8x128xf32>
    tpu.vector_store %arg3[%c0_3, %c0_4], %2 {strides = array<i32>} : memref<8x128xf32, #tpu.memory_space<vmem>>, vector<8x128xf32>,
    return
  }
  func.func @transform_0(%arg0: i32) -> (i32, i32) {
    %c0_i32 = arith.constant 0 : i32
    %c0_i32_0 = arith.constant 0 : i32
    return %arg0, %c0_i32 : i32, i32
  }
  func.func @transform_1(%arg0: i32) -> (i32, i32) {
    %c0_i32 = arith.constant 0 : i32
    %c0_i32_0 = arith.constant 0 : i32
    %c0_i32_1 = arith.constant 0 : i32
    return %c0_i32, %c0_i32_0 : i32, i32
  }
  func.func @transform_2(%arg0: i32) -> (i32, i32) {
    %c0_i32 = arith.constant 0 : i32
    %c0_i32_0 = arith.constant 0 : i32
    return %arg0, %c0_i32 : i32, i32
  }
}

module attributes {stable_mosaic.version = 11 : i64} {
  func.func @mlp_kernel(%arg0: i32, %arg1: memref<16x128xf32, #tpu.memory_space<vmem>>, %arg2: memref<128x128xf32, #tpu.memory_space<vmem>>, %arg3: memref<1x128xf32, #tpu.memory_space<vmem>>, %arg4: memref<128x128xf32, #tpu.memory_space<vmem>>, %arg5: memref<1x128xf32, #tpu.memory_space<vmem>>, %arg6: memref<128x128xf32, #tpu.memory_space<vmem>>, %arg7: memref<1x128xf32, #tpu.memory_space<vmem>>, %arg8: memref<16x128xf32, #tpu.memory_space<vmem>>) attributes {dimension_semantics = [#tpu.dimension_semantics<parallel>], iteration_bounds = array<i64: 1>, scalar_prefetch = 0 : i64, scratch_operands = 0 : i64, tpu.core_type = #tpu.core_type<tc>, window_params = [{transform_indices = @transform_0, window_bounds = array<i64: 16, 128>}, {pipeline_mode = #tpu.pipeline_mode<synchronous>, transform_indices = @transform_1, window_bounds = array<i64: 128, 128>}, {pipeline_mode = #tpu.pipeline_mode<synchronous>, transform_indices = @transform_2, window_bounds = array<i64: 1, 128>}, {pipeline_mode = #tpu.pipeline_mode<synchronous>, transform_indices = @transform_3, window_bounds = array<i64: 128, 128>}, {pipeline_mode = #tpu.pipeline_mode<synchronous>, transform_indices = @transform_4, window_bounds = array<i64: 1, 128>}, {pipeline_mode = #tpu.pipeline_mode<synchronous>, transform_indices = @transform_5, window_bounds = array<i64: 128, 128>}, {pipeline_mode = #tpu.pipeline_mode<synchronous>, transform_indices = @transform_6, window_bounds = array<i64: 1, 128>}, {transform_indices = @transform_7, window_bounds = array<i64: 16, 128>}]} {
    %c0 = arith.constant 0 : index
    %c0_0 = arith.constant 0 : index
    %0 = vector.load %arg1[%c0, %c0_0] : memref<16x128xf32, #tpu.memory_space<vmem>>, vector<16x128xf32>
    %c0_1 = arith.constant 0 : index
    %c0_2 = arith.constant 0 : index
    %1 = vector.load %arg2[%c0_1, %c0_2] : memref<128x128xf32, #tpu.memory_space<vmem>>, vector<128x128xf32>
    %cst = arith.constant dense<0.000000e+00> : vector<16x128xf32>
    %2 = tpu.matmul %0, %1, %cst {dimension_numbers = #tpu.dot_dimension_numbers<[1], [0], [0], [1], [0, 0, 1, 1], [], []>} : vector<16x128xf32>, vector<128x128xf32>, vector<16x128xf32> -> vector<16x128xf32>
    %c0_3 = arith.constant 0 : index
    %c0_4 = arith.constant 0 : index
    %3 = vector.load %arg3[%c0_3, %c0_4] : memref<1x128xf32, #tpu.memory_space<vmem>>, vector<1x128xf32>
    %4 = vector.broadcast %3 : vector<1x128xf32> to vector<16x128xf32>
    %5 = arith.addf %2, %4 : vector<16x128xf32>
    %6 = arith.mulf %5, %5 : vector<16x128xf32>
    %7 = arith.mulf %5, %6 : vector<16x128xf32>
    %cst_5 = arith.constant 4.471500e-02 : f32
    %8 = vector.broadcast %cst_5 : f32 to vector<16x128xf32>
    %9 = arith.mulf %8, %7 : vector<16x128xf32>
    %10 = arith.addf %5, %9 : vector<16x128xf32>
    %cst_6 = arith.constant 0.797884583 : f32
    %11 = vector.broadcast %cst_6 : f32 to vector<16x128xf32>
    %12 = arith.mulf %11, %10 : vector<16x128xf32>
    %13 = math.tanh %12 : vector<16x128xf32>
    %cst_7 = arith.constant 1.000000e+00 : f32
    %14 = vector.broadcast %cst_7 : f32 to vector<16x128xf32>
    %15 = arith.addf %14, %13 : vector<16x128xf32>
    %cst_8 = arith.constant 5.000000e-01 : f32
    %16 = vector.broadcast %cst_8 : f32 to vector<16x128xf32>
    %17 = arith.mulf %16, %15 : vector<16x128xf32>
    %18 = arith.mulf %5, %17 : vector<16x128xf32>
    %c0_9 = arith.constant 0 : index
    %c0_10 = arith.constant 0 : index
    %19 = vector.load %arg4[%c0_9, %c0_10] : memref<128x128xf32, #tpu.memory_space<vmem>>, vector<128x128xf32>
    %cst_11 = arith.constant dense<0.000000e+00> : vector<16x128xf32>
    %20 = tpu.matmul %18, %19, %cst_11 {dimension_numbers = #tpu.dot_dimension_numbers<[1], [0], [0], [1], [0, 0, 1, 1], [], []>} : vector<16x128xf32>, vector<128x128xf32>, vector<16x128xf32> -> vector<16x128xf32>
    %c0_12 = arith.constant 0 : index
    %c0_13 = arith.constant 0 : index
    %21 = vector.load %arg5[%c0_12, %c0_13] : memref<1x128xf32, #tpu.memory_space<vmem>>, vector<1x128xf32>
    %22 = vector.broadcast %21 : vector<1x128xf32> to vector<16x128xf32>
    %23 = arith.addf %20, %22 : vector<16x128xf32>
    %24 = arith.mulf %23, %23 : vector<16x128xf32>
    %25 = arith.mulf %23, %24 : vector<16x128xf32>
    %cst_14 = arith.constant 4.471500e-02 : f32
    %26 = vector.broadcast %cst_14 : f32 to vector<16x128xf32>
    %27 = arith.mulf %26, %25 : vector<16x128xf32>
    %28 = arith.addf %23, %27 : vector<16x128xf32>
    %cst_15 = arith.constant 0.797884583 : f32
    %29 = vector.broadcast %cst_15 : f32 to vector<16x128xf32>
    %30 = arith.mulf %29, %28 : vector<16x128xf32>
    %31 = math.tanh %30 : vector<16x128xf32>
    %cst_16 = arith.constant 1.000000e+00 : f32
    %32 = vector.broadcast %cst_16 : f32 to vector<16x128xf32>
    %33 = arith.addf %32, %31 : vector<16x128xf32>
    %cst_17 = arith.constant 5.000000e-01 : f32
    %34 = vector.broadcast %cst_17 : f32 to vector<16x128xf32>
    %35 = arith.mulf %34, %33 : vector<16x128xf32>
    %36 = arith.mulf %23, %35 : vector<16x128xf32>
    %c0_18 = arith.constant 0 : index
    %c0_19 = arith.constant 0 : index
    %37 = vector.load %arg6[%c0_18, %c0_19] : memref<128x128xf32, #tpu.memory_space<vmem>>, vector<128x128xf32>
    %cst_20 = arith.constant dense<0.000000e+00> : vector<16x128xf32>
    %38 = tpu.matmul %36, %37, %cst_20 {dimension_numbers = #tpu.dot_dimension_numbers<[1], [0], [0], [1], [0, 0, 1, 1], [], []>} : vector<16x128xf32>, vector<128x128xf32>, vector<16x128xf32> -> vector<16x128xf32>
    %c0_21 = arith.constant 0 : index
    %c0_22 = arith.constant 0 : index
    %39 = vector.load %arg7[%c0_21, %c0_22] : memref<1x128xf32, #tpu.memory_space<vmem>>, vector<1x128xf32>
    %40 = vector.broadcast %39 : vector<1x128xf32> to vector<16x128xf32>
    %41 = arith.addf %38, %40 : vector<16x128xf32>
    %c0_23 = arith.constant 0 : index
    %c0_24 = arith.constant 0 : index
    %42 = vector.load %arg8[%c0_23, %c0_24] : memref<16x128xf32, #tpu.memory_space<vmem>>, vector<16x128xf32>
    tpu.vector_store %arg8[%c0_23, %c0_24], %41 {strides = array<i32>} : memref<16x128xf32, #tpu.memory_space<vmem>>, vector<16x128xf32>,
    return
  }
  func.func @transform_0(%arg0: i32) -> (i32, i32) {
    %c0_i32 = arith.constant 0 : i32
    %c0_i32_0 = arith.constant 0 : i32
    return %arg0, %c0_i32 : i32, i32
  }
  func.func @transform_1(%arg0: i32) -> (i32, i32) {
    %c0_i32 = arith.constant 0 : i32
    %c0_i32_0 = arith.constant 0 : i32
    %c0_i32_1 = arith.constant 0 : i32
    return %c0_i32, %c0_i32_0 : i32, i32
  }
  func.func @transform_2(%arg0: i32) -> (i32, i32) {
    %c0_i32 = arith.constant 0 : i32
    %c0_i32_0 = arith.constant 0 : i32
    %c0_i32_1 = arith.constant 0 : i32
    return %c0_i32, %c0_i32_0 : i32, i32
  }
  func.func @transform_3(%arg0: i32) -> (i32, i32) {
    %c0_i32 = arith.constant 0 : i32
    %c0_i32_0 = arith.constant 0 : i32
    %c0_i32_1 = arith.constant 0 : i32
    return %c0_i32, %c0_i32_0 : i32, i32
  }
  func.func @transform_4(%arg0: i32) -> (i32, i32) {
    %c0_i32 = arith.constant 0 : i32
    %c0_i32_0 = arith.constant 0 : i32
    %c0_i32_1 = arith.constant 0 : i32
    return %c0_i32, %c0_i32_0 : i32, i32
  }
  func.func @transform_5(%arg0: i32) -> (i32, i32) {
    %c0_i32 = arith.constant 0 : i32
    %c0_i32_0 = arith.constant 0 : i32
    %c0_i32_1 = arith.constant 0 : i32
    return %c0_i32, %c0_i32_0 : i32, i32
  }
  func.func @transform_6(%arg0: i32) -> (i32, i32) {
    %c0_i32 = arith.constant 0 : i32
    %c0_i32_0 = arith.constant 0 : i32
    %c0_i32_1 = arith.constant 0 : i32
    return %c0_i32, %c0_i32_0 : i32, i32
  }
  func.func @transform_7(%arg0: i32) -> (i32, i32) {
    %c0_i32 = arith.constant 0 : i32
    %c0_i32_0 = arith.constant 0 : i32
    return %arg0, %c0_i32 : i32, i32
  }
}

</mosaic_0001>

<bundles_post_ra>
// kernel: tpu_custom_call.1
= control target key start
LH: loop header
LB: loop body
LE: loop exit
PB: predicated region body
PF: predicated region fallthrough
CT: control target
= control target key end

     0   :  { %7 = vsyncpa [#allocation3], 0  ;;  %s633_s0 = inlined_call_operand.hbm [shape: f32[16,128], index: 0, kind: input, shape index: {}]   ;;  %s634_s1 = inlined_call_operand.hbm [shape: f32[8,128], index: 1, kind: input, shape index: {}]   ;;  %s635_s2 = inlined_call_operand.hbm [shape: f32[16,128], index: 2, kind: output, shape index: {}]  }
   0x1   :  { %9 = vsyncpa [#allocation3 + $0x1], 0 }
   0x2   :  { %10 = vsyncpa [#allocation6], 0 }
   0x3   :  { %11 = vsyncpa [#allocation4], 0 }
   0x4   :  { %13 = vsyncpa [#allocation4 + $0x1], 0  ;;  %s495_s9 = smov 0   ;;  %s497_s10 = smov 0  }
   0x5   :  { %s499_s11 = smov 0   ;;  %s501_s12 = smov 0  }
   0x6 LB: > { %s516_s13 = sadd.s32 4294967295, %s477_s12   ;;  %s276_s14 = sadd.s32 4294967294, %s477_s12   ;;  %s477_s12 = sphi %s501_s12, %s645_s12   ;;  %s473_s11 = sphi %s499_s11, %s644_s11   ;;  %s469_s10 = sphi %s497_s10, %s643_s10   ;;  %s465_s9 = sphi %s495_s9, %s642_s9  }
   0x7   : > { %p39_p0 = scmp.ne.s32.totalorder %s469_s10, %s465_s9  ;;  %p40_p1 = scmp.eq.s32.totalorder %s516_s13, 0 }
   0x8   : > { %p84_p2 = scmp.eq.s32.totalorder %s516_s13, 1  ;;  %p90_p3 = scmp.eq.s32.totalorder %s276_s14, 1 }
   0x9   : > { %p525_p4 = por %p40_p1, %p39_p0  ;;  %p277_p5 = scmp.ge.s32.totalorder %s477_s12, 1 }
   0xa   : > { %p530_p6 = por %p90_p3, %p39_p0  ;;  %p97_p7 = scmp.lt.s32.totalorder %s477_s12, 3 }
   0xb   : > { %s109_s19 = sshll.u32 %s634_s1, 4  ;;  %s479_s21 = smov [#allocation5]   ;;  %s110_s19 = int_to_ptr.hbm [resolvable:$true] %s109_s19 }
   0xc   : > { %p538_p8 = pnand %p277_p5, %p97_p7  ;;  %s111_s22 = sshll.u32 %s479_s21, 4  ;;  %s112_s22 = int_to_ptr.vmem [resolvable:$true] %s111_s22 }
   0xd   : > { %s548_s23 = sadd.s32 1, %s477_s12   ;;  %s26_s24 = sadd.s32 1, %s473_s11 }
   0xe   : > { %p298_p10 = pneg %p538_p8  ;;  %s23_s25 = ssub.s32 %s477_s12, %s548_s23 }
   0xf   : > { %p24_p12 = scmp.eq.s32.totalorder %s23_s25, 0  ;;  %p33_p13 = scmp.ne.s32.totalorder %s473_s11, %s469_s10 }
  0x10   : > { %p299_p11 = pnand %p298_p10, %p40_p1  ;;  %p34_p0 = scmp.eq.s32.totalorder %s477_s12, 0 }
  0x11   : > { %s557_s26 = scalar_select %p24_p12, %s473_s11, %s26_s24  }
  0x12   : > { %301 = dma.hbm_to_vmem [thread:$0]  (!%p299_p11), %s110_s19, 128, %s112_s22, [#allocation6]  }
  0x13   : > { %p561_p3 = por %p84_p2, %p33_p13  ;;  %p311_p5 = scmp.lt.s32.totalorder %s477_s12, 2 }
  0x14   : > { %s122_s28 = sand.u32 1, %s473_s11   ;;  %s281_s29 = sshll.u32 %s477_s12, 3 }
  0x15   : > { %p35_p7 = por %p34_p0, %p33_p13  ;;  %s280_s30 = sshll.u32 %s122_s28, 3 }
  0x16   : > { %s130_s5 = scalar_lea.hbm %s633_s0, %s281_s29  ;;  %s126_s7 = scalar_lea.vmem [#allocation2], %s280_s30 }
  0x17   : > { %s132_s6 = sshll.u32 %s130_s5, 4  ;;  %s134_s8 = sshll.u32 %s126_s7, 4  ;;  %s133_s6 = int_to_ptr.hbm [resolvable:$true] %s132_s6  ;;  %s135_s8 = int_to_ptr.vmem [resolvable:$true] %s134_s8 }
  0x18   : > { %p571_p10 = pnand %p311_p5, %p35_p7  ;;  %s123_s17 = scalar_lea.sflag [#allocation3], %s122_s28 }
  0x19   : > { %s377_s18 = sshra.s32 %s133_s6, 4  ;;  %s384_s24 = scalar_lea.hbm %s633_s0, 16  ;;  %s378_s18 = int_to_ptr.hbm [resolvable:$true] %s377_s18 }
  0x1a   : > { %s379_s19 = scalar_lea.hbm %s378_s18, 8  ;;  %p381_p11 = pneg %p571_p10 }
  0x1b   : > { %p380_p2 = scmp.ne.s32.totalorder %s378_s18, %s379_s19  ;;  %p385_p0 = scmp.lt.s32.totalorder %s378_s18, %s633_s0 }
  0x1c   : > { %p386_p5 = scmp.lt.s32.totalorder %s384_s24, %s379_s19 }
  0x1d   : > { %p382_p12 = pnand %p381_p11, %p380_p2 }
  0x1e   : > { %p387_p7 = por %p386_p5, %p385_p0 }
  0x1f   : > { %p383_p13 = pneg %p382_p12 }
  0x21   : > { %p388_p9 = pnand %p387_p7, %p383_p13 }
  0x23   : > { %391 = shalt.err (!%p388_p9)
}
  0x24   : > { %305 = dma.hbm_to_vmem [thread:$0]  (!%p571_p10), %s133_s6, 128, %s135_s8, %s123_s17  }
  0x25   : > { %143 = sbr.rel (%p538_p8) target bundleno = 60 (0x3c), region = 28  ;;  %s588_s28 = sand.u32 (!%p538_p8), 1, %s469_s10  }
  0x26   : > { %s283_s30 = sshll.u32 (!%p538_p8), %s588_s28, 3  ;;  %s146_s3 = scalar_lea.sflag (!%p538_p8), [#allocation3], %s588_s28 }
  0x27   : > { %s149_s4 = scalar_lea.vmem (!%p538_p8), [#allocation2], %s283_s30 }
  0x2a   : > { %452 = dma.done.wait (%p525_p4), %s146_s3, 128  }
  0x2b   : > { %454 = vsyncadd (%p525_p4), %s146_s3, 4294967168 }
  0x2c   : > { %456 = dma.done.wait (%p40_p1), [#allocation6], 128  }
  0x2d   : > { %458 = vsyncadd (%p40_p1), [#allocation6], 4294967168  ;;  %s287_s20 = sshll.u32 %s516_s13, 3  ;;  %s175_s8 = scalar_lea.vmem [#allocation7], %s283_s30  ;;  %v176_v0 = vld [vmem:[%s149_s4] sm:$0xff]  ;;  %v177_v1 = vld [vmem:[#allocation5] sm:$0xff] }
  0x2e   : > { %s191_s7 = scalar_lea.hbm %s635_s2, %s287_s20  ;;  %s193_s14 = sshll.u32 %s175_s8, 4  ;;  %v178_v2 = vadd.f32 %v177_v1, %v176_v0  ;;  %s194_s14 = int_to_ptr.vmem [resolvable:$true] %s193_s14 }
  0x2f   : > { %s195_s17 = sshll.u32 %s191_s7, 4  ;;  %s181_s15 = scalar_lea.sflag [#allocation4], %s588_s28  ;;  %s196_s17 = int_to_ptr.hbm [resolvable:$true] %s195_s17 }
  0x30   : > { %179 = vst [vmem:[%s175_s8] sm:$0xff] %v178_v2  ;;  %s421_s18 = sshra.s32 %s196_s17, 4  ;;  %s427_s22 = scalar_lea.hbm %s635_s2, 16  ;;  %s422_s18 = int_to_ptr.hbm [resolvable:$true] %s421_s18 }
  0x31   : > { %s423_s19 = scalar_lea.hbm %s422_s18, 8  ;;  %p428_p9 = scmp.lt.s32.totalorder %s422_s18, %s635_s2 }
  0x32   : > { %p424_p1 = scmp.ne.s32.totalorder %s422_s18, %s423_s19  ;;  %p429_p10 = scmp.lt.s32.totalorder %s427_s22, %s423_s19 }
  0x34   : > { %p425_p4 = pnand %p424_p1, %p561_p3  ;;  %p430_p2 = por %p429_p10, %p428_p9 }
  0x36   : > { %p426_p8 = pneg %p425_p4 }
  0x38   : > { %p431_p11 = pnand %p430_p2, %p426_p8 }
  0x3a   : > { %434 = shalt.err (!%p431_p11)
}
  0x3b   : > { %296 = dma.vmem_to_hbm [thread:$0]  (%p561_p3), %s194_s14, 128, %s196_s17, %s181_s15  }
  0x3c PF: > { %s207_s29 = sand.u32 1, %s465_s9   ;;  %p641_p12 = scmp.ge.s32.totalorder %s477_s12, 2 }
  0x3d   : > { %s208_s28 = scalar_lea.sflag [#allocation4], %s207_s29 }
  0x3e   : > { %p307_p13 = pnand %p641_p12, %p530_p6 }
  0x40   : > { %p308_p0 = pneg %p307_p13 }
  0x42   : > { %460 = dma.done.wait (%p308_p0), %s208_s28, 128  }
  0x43   : > { %462 = vsyncadd (%p308_p0), %s208_s28, 4294967168  ;;  %p16_p5 = scmp.ge.s32.totalorder %s548_s23, 4   ;;  %s642_s9 = smov %s469_s10 }
  0x44   : > { %s643_s10 = smov %s473_s11  ;;  %s644_s11 = smov %s557_s26 }
  0x45   : > { %s645_s12 = smov %s548_s23  ;;  %18 = sbr.rel (!%p16_p5) target bundleno = 6 (0x6), region = 77 }
  0x4a   :  { %214 = vsyncpa [#allocation3], 1 }
  0x4b   :  { %216 = vsyncpa [#allocation3 + $0x1], 1 }
  0x4c   :  { %217 = vsyncpa [#allocation6], 1 }
  0x4d   :  { %218 = vsyncpa [#allocation4], 1 }
  0x4e   :  { %220 = vsyncpa [#allocation4 + $0x1], 1 }

// kernel: _mlp_forward_jit.1
= control target key start
LH: loop header
LB: loop body
LE: loop exit
PB: predicated region body
PF: predicated region fallthrough
CT: control target
= control target key end

     0   :  { %12 = vsyncpa [#allocation3], 0  ;;  %s483_s0 = inlined_call_operand.vmem [shape: f32[16,128], index: 0, kind: input, shape index: {}]   ;;  %s484_s1 = inlined_call_operand.hbm [shape: f32[128,128], index: 1, kind: input, shape index: {}]   ;;  %s485_s2 = inlined_call_operand.vmem [shape: f32[1,128], index: 2, kind: input, shape index: {}]   ;;  %s486_s3 = inlined_call_operand.hbm [shape: f32[128,128], index: 3, kind: input, shape index: {}]   ;;  %s487_s4 = inlined_call_operand.vmem [shape: f32[1,128], index: 4, kind: input, shape index: {}]   ;;  %s488_s5 = inlined_call_operand.hbm [shape: f32[128,128], index: 5, kind: input, shape index: {}]   ;;  %s489_s6 = inlined_call_operand.vmem [shape: f32[1,128], index: 6, kind: input, shape index: {}]   ;;  %s490_s7 = inlined_call_operand.hbm [shape: f32[16,128], index: 7, kind: output, shape index: {}]  }
   0x1   :  { %13 = vsyncpa [#allocation6], 0 }
   0x2   :  { %14 = vsyncpa [#allocation4], 0  ;;  %s36_s26 = sshll.u32 %s486_s3, 4  ;;  %s398_s27 = smov [#allocation5]   ;;  %s37_s26 = int_to_ptr.hbm [resolvable:$true] %s36_s26 }
   0x3   :  { %s38_s28 = sshll.u32 %s398_s27, 4  ;;  %s21_s8 = sshll.u32 %s484_s1, 4  ;;  %s39_s28 = int_to_ptr.vmem [resolvable:$true] %s38_s28  ;;  %s22_s8 = int_to_ptr.hbm [resolvable:$true] %s21_s8 }
   0x4   :  { %s399_s9 = smov 128   ;;  %s400_s10 = smov 8  }
   0x5   :  { %44 = dma.hbm_to_vmem [thread:$0]  %s37_s26, 2048, %s39_s28, [#allocation6], %s399_s9, %s399_s9, %s400_s10  }
   0x6   :  { %s401_s11 = smov [#allocation2]   ;;  %s51_s3 = sshll.u32 %s488_s5, 4  ;;  %s52_s3 = int_to_ptr.hbm [resolvable:$true] %s51_s3 }
   0x7   :  { %s23_s12 = sshll.u32 %s401_s11, 4  ;;  %s402_s1 = smov [#allocation7]   ;;  %s24_s12 = int_to_ptr.vmem [resolvable:$true] %s23_s12 }
   0x8   :  { %29 = dma.hbm_to_vmem [thread:$0]  %s22_s8, 2048, %s24_s12, [#allocation3], %s399_s9, %s399_s9, %s400_s10  }
   0x9   :  { %s53_s15 = sshll.u32 %s402_s1, 4  ;;  %s54_s15 = int_to_ptr.vmem [resolvable:$true] %s53_s15 }
   0xa   :  { %59 = dma.hbm_to_vmem [thread:$0]  %s52_s3, 2048, %s54_s15, [#allocation6], %s399_s9, %s399_s9, %s400_s10  }
   0xb   :  { %392 = dma.done.wait [#allocation3], 2048  }
   0xc   :  { %393 = vsyncadd [#allocation3], 4294965248 }
   0xd   :  { %394 = dma.done.wait [#allocation6], 4096  }
   0xe   :  { %395 = vsyncadd [#allocation6], 4294963200  ;;  %v91_v0 = vld [vmem:[#allocation2 + $0x78] sm:$0xff]  ;;  %v90_v1 = vld [vmem:[#allocation2 + $0x70] sm:$0xff]  ;;  %s403_s22 = smov [#allocation8]   ;;  %s249_s26 = sshll.u32 %s490_s7, 4  ;;  %s250_s26 = int_to_ptr.hbm [resolvable:$true] %s249_s26 }
   0xf   :  { %96 = vmatpush.msra.mxu0 %v91_v0  ;;  %263 = vmatpush.msra.mxu3 %v91_v0  ;;  %v89_v2 = vld [vmem:[#allocation2 + $0x68] sm:$0xff]  ;;  %v88_v3 = vld [vmem:[#allocation2 + $0x60] sm:$0xff]  ;;  %v87_v4 = vld [vmem:[#allocation2 + $0x58] sm:$0xff]  ;;  %s247_s23 = sshll.u32 %s403_s22, 4  ;;  %s248_s23 = int_to_ptr.vmem [resolvable:$true] %s247_s23 }
  0x10   :  { %v152_v5 = vld [vmem:[#allocation5 + $0x78] sm:$0xff]  ;;  %v151_v6 = vld [vmem:[#allocation5 + $0x70] sm:$0xff]  ;;  %v150_v8 = vld [vmem:[#allocation5 + $0x68] sm:$0xff] }
  0x11   :  { %97 = vmatpush.msra.mxu0 %v90_v1  ;;  %264 = vmatpush.msra.mxu3 %v90_v1  ;;  %v86_v7 = vld [vmem:[#allocation2 + $0x50] sm:$0xff]  ;;  %v85_v9 = vld [vmem:[#allocation2 + $0x48] sm:$0xff]  ;;  %v84_v10 = vld [vmem:[#allocation2 + $0x40] sm:$0xff] }
  0x12   :  { %157 = vmatpush.msra.mxu1 %v152_v5  ;;  %v83_v11 = vld [vmem:[#allocation2 + $0x38] sm:$0xff]  ;;  %v82_v12 = vld [vmem:[#allocation2 + $0x30] sm:$0xff]  ;;  %v81_v13 = vld [vmem:[#allocation2 + $0x28] sm:$0xff] }
  0x13   :  { %98 = vmatpush.msra.mxu0 %v89_v2  ;;  %265 = vmatpush.msra.mxu3 %v89_v2  ;;  %v80_v14 = vld [vmem:[#allocation2 + $0x20] sm:$0xff]  ;;  %v79_v15 = vld [vmem:[#allocation2 + $0x18] sm:$0xff]  ;;  %v78_v16 = vld [vmem:[#allocation2 + $0x10] sm:$0xff] }
  0x14   :  { %158 = vmatpush.msra.mxu1 %v151_v6  ;;  %v77_v17 = vld [vmem:[#allocation2 + $0x8] sm:$0xff]  ;;  %v76_v18 = vld [vmem:[#allocation2] sm:$0xff]  ;;  %v148_v22 = vld [vmem:[#allocation5 + $0x58] sm:$0xff] }
  0x15   :  { %99 = vmatpush.msra.mxu0 %v88_v3  ;;  %266 = vmatpush.msra.mxu3 %v88_v3  ;;  %v74_v19 = vld [vmem:[%s483_s0] sm:$0xff]  ;;  %v75_v20 = vld [vmem:[%s483_s0 + $0x8] sm:$0xff]  ;;  %v147_v23 = vld [vmem:[#allocation5 + $0x50] sm:$0xff] }
  0x16   :  { %159 = vmatpush.msra.mxu1 %v150_v8  ;;  %v149_v21 = vld [vmem:[#allocation5 + $0x60] sm:$0xff]  ;;  %v146_v24 = vld [vmem:[#allocation5 + $0x48] sm:$0xff]  ;;  %v144_v26 = vld [vmem:[#allocation5 + $0x38] sm:$0xff] }
  0x17   :  { %100 = vmatpush.msra.mxu0 %v87_v4  ;;  %267 = vmatpush.msra.mxu3 %v87_v4  ;;  %v145_v25 = vld [vmem:[#allocation5 + $0x40] sm:$0xff]  ;;  %v143_v27 = vld [vmem:[#allocation5 + $0x30] sm:$0xff]  ;;  %v142_v28 = vld [vmem:[#allocation5 + $0x28] sm:$0xff] }
  0x18   :  { %160 = vmatpush.msra.mxu1 %v149_v21  ;;  %v141_v29 = vld [vmem:[#allocation5 + $0x20] sm:$0xff]  ;;  %v140_v30 = vld [vmem:[#allocation5 + $0x18] sm:$0xff]  ;;  %v139_v31 = vld [vmem:[#allocation5 + $0x10] sm:$0xff] }
  0x19   :  { %101 = vmatpush.msra.mxu0 %v86_v7  ;;  %268 = vmatpush.msra.mxu3 %v86_v7  ;;  %v138_v32 = vld [vmem:[#allocation5 + $0x8] sm:$0xff]  ;;  %v137_v33 = vld [vmem:[#allocation5] sm:$0xff]  ;;  %v213_v37 = vld [vmem:[#allocation7 + $0x78] sm:$0xff] }
  0x1a   :  { %161 = vmatpush.msra.mxu1 %v148_v22  ;;  %v285_v34 = vld [vmem:[%s485_s2] ss:$0 sm:$0xff]  ;;  %v212_v38 = vld [vmem:[#allocation7 + $0x70] sm:$0xff]  ;;  %218 = vmatpush.msra.mxu2 %v213_v37  ;;  %v211_v40 = vld [vmem:[#allocation7 + $0x68] sm:$0xff] }
  0x1b   :  { %102 = vmatpush.msra.mxu0 %v85_v9  ;;  %269 = vmatpush.msra.mxu3 %v85_v9  ;;  %v210_v60 = vld [vmem:[#allocation7 + $0x60] sm:$0xff]  ;;  %v209_v61 = vld [vmem:[#allocation7 + $0x58] sm:$0xff]  ;;  %v208_v62 = vld [vmem:[#allocation7 + $0x50] sm:$0xff] }
  0x1c   :  { %162 = vmatpush.msra.mxu1 %v147_v23  ;;  %219 = vmatpush.msra.mxu2 %v212_v38  ;;  %v207_v63 = vld [vmem:[#allocation7 + $0x48] sm:$0xff]  ;;  %v206_v0 = vld [vmem:[#allocation7 + $0x40] sm:$0xff]  ;;  %v205_v1 = vld [vmem:[#allocation7 + $0x38] sm:$0xff] }
  0x1d   :  { %103 = vmatpush.msra.mxu0 %v84_v10  ;;  %270 = vmatpush.msra.mxu3 %v84_v10  ;;  %v204_v2 = vld [vmem:[#allocation7 + $0x30] sm:$0xff]  ;;  %v203_v3 = vld [vmem:[#allocation7 + $0x28] sm:$0xff]  ;;  %v202_v4 = vld [vmem:[#allocation7 + $0x20] sm:$0xff] }
  0x1e   :  { %163 = vmatpush.msra.mxu1 %v146_v24  ;;  %220 = vmatpush.msra.mxu2 %v211_v40  ;;  %v201_v5 = vld [vmem:[#allocation7 + $0x18] sm:$0xff]  ;;  %v200_v6 = vld [vmem:[#allocation7 + $0x10] sm:$0xff]  ;;  %v199_v7 = vld [vmem:[#allocation7 + $0x8] sm:$0xff] }
  0x1f   :  { %104 = vmatpush.msra.mxu0 %v83_v11  ;;  %271 = vmatpush.msra.mxu3 %v83_v11  ;;  %v198_v8 = vld [vmem:[#allocation7] sm:$0xff] }
  0x20   :  { %164 = vmatpush.msra.mxu1 %v145_v25  ;;  %221 = vmatpush.msra.mxu2 %v210_v60  ;;  %v286_v9 = vld [vmem:[%s487_s4] ss:$0 sm:$0xff] }
  0x21   :  { %105 = vmatpush.msra.mxu0 %v82_v12  ;;  %272 = vmatpush.msra.mxu3 %v82_v12 }
  0x22   :  { %165 = vmatpush.msra.mxu1 %v144_v26  ;;  %222 = vmatpush.msra.mxu2 %v209_v61 }
  0x23   :  { %106 = vmatpush.msra.mxu0 %v81_v13  ;;  %273 = vmatpush.msra.mxu3 %v81_v13 }
  0x24   :  { %166 = vmatpush.msra.mxu1 %v143_v27  ;;  %223 = vmatpush.msra.mxu2 %v208_v62 }
  0x25   :  { %107 = vmatpush.msra.mxu0 %v80_v14  ;;  %274 = vmatpush.msra.mxu3 %v80_v14 }
  0x26   :  { %167 = vmatpush.msra.mxu1 %v142_v28  ;;  %224 = vmatpush.msra.mxu2 %v207_v63 }
  0x27   :  { %108 = vmatpush.msra.mxu0 %v79_v15  ;;  %275 = vmatpush.msra.mxu3 %v79_v15 }
  0x28   :  { %168 = vmatpush.msra.mxu1 %v141_v29  ;;  %225 = vmatpush.msra.mxu2 %v206_v0 }
  0x29   :  { %109 = vmatpush.msra.mxu0 %v78_v16  ;;  %276 = vmatpush.msra.mxu3 %v78_v16 }
  0x2a   :  { %169 = vmatpush.msra.mxu1 %v140_v30  ;;  %226 = vmatpush.msra.mxu2 %v205_v1 }
  0x2b   :  { %110 = vmatpush.msra.mxu0 %v77_v17  ;;  %277 = vmatpush.msra.mxu3 %v77_v17 }
  0x2c   :  { %170 = vmatpush.msra.mxu1 %v139_v31  ;;  %227 = vmatpush.msra.mxu2 %v204_v2 }
  0x2d   :  { %111 = vmatpush.msra.mxu0 %v76_v18  ;;  %278 = vmatpush.msra.mxu3 %v76_v18 }
  0x2e   :  { %112 = vmatmul.f32.vlgmr.msra.gmra.mxu0 %v74_v19  ;;  %115 = vmatmul.f32.vlgmr.msra.gmra.mxu3 %v75_v20 }
  0x2f   :  { %171 = vmatpush.msra.mxu1 %v138_v32  ;;  %228 = vmatpush.msra.mxu2 %v203_v3  ;;  %v287_v32 = vld [vmem:[%s489_s6] ss:$0 sm:$0xff] }
  0x31   :  { %172 = vmatpush.msra.mxu1 %v137_v33  ;;  %229 = vmatpush.msra.mxu2 %v202_v4 }
  0x33   :  { %230 = vmatpush.msra.mxu2 %v201_v5 }
  0x35   :  { %231 = vmatpush.msra.mxu2 %v200_v6 }
  0x37   :  { %232 = vmatpush.msra.mxu2 %v199_v7 }
  0x39   :  { %233 = vmatpush.msra.mxu2 %v198_v8 }
  0xab   :  { %v113_v35 = vpop.f32.mrf.mxu0 }
  0xac   :  { %v114_v36 = vadd.f32 %v285_v34, %v113_v35 }
  0xae   :  { %v119_v39 = vmul.f32 %v114_v36, %v114_v36 }
  0xb0   :  { %v121_v41 = vmul.f32 %v119_v39, %v114_v36 }
  0xb1   :  { %v116_v42 = vpop.f32.mrf.mxu3 }
  0xb2   :  { %v117_v43 = vadd.f32 %v285_v34, %v116_v42  ;;  %v123_v44 = vmul.f32 0.044715, %v121_v41 }
  0xb4   :  { %v120_v45 = vmul.f32 %v117_v43, %v117_v43  ;;  %v125_v46 = vadd.f32 %v123_v44, %v114_v36 }
  0xb6   :  { %v122_v47 = vmul.f32 %v120_v45, %v117_v43  ;;  %v127_v48 = vmul.f32 0.7978846, %v125_v46 }
  0xb8   :  { %288 = vtanh.f32 %v127_v48  ;;  %v124_v49 = vmul.f32 0.044715, %v122_v47 }
  0xba   :  { %v126_v50 = vadd.f32 %v124_v49, %v117_v43 }
  0xbc   :  { %v128_v51 = vmul.f32 0.7978846, %v126_v50 }
  0xbe   :  { %v289_v52 = vpop.eup %288  ;;  %290 = vtanh.f32 %v128_v51 }
  0xbf   :  { %v131_v53 = vadd.f32 1.0, %v289_v52 }
  0xc1   :  { %v133_v54 = vmul.f32 0.5, %v131_v53 }
  0xc3   :  { %v135_v55 = vmul.f32 %v133_v54, %v114_v36 }
  0xc4   :  { %v291_v56 = vpop.eup %290 }
  0xc5   :  { %173 = vmatmul.f32.vlgmr.msra.gmra.mxu1 %v135_v55  ;;  %v132_v57 = vadd.f32 1.0, %v291_v56 }
  0xc7   :  { %v134_v58 = vmul.f32 0.5, %v132_v57 }
  0xc9   :  { %v136_v59 = vmul.f32 %v134_v58, %v117_v43 }
  0xcd   :  { %176 = vmatmul.f32.gmra.mxu1 %v136_v59 }
 0x142   :  { %v174_v10 = vpop.f32.mrf.mxu1 }
 0x143   :  { %v175_v11 = vadd.f32 %v286_v9, %v174_v10 }
 0x145   :  { %v180_v12 = vmul.f32 %v175_v11, %v175_v11 }
 0x147   :  { %v182_v13 = vmul.f32 %v180_v12, %v175_v11 }
 0x149   :  { %v184_v14 = vmul.f32 0.044715, %v182_v13 }
 0x14a   :  { %v177_v15 = vpop.f32.mrf.mxu1 }
 0x14b   :  { %v178_v16 = vadd.f32 %v286_v9, %v177_v15  ;;  %v186_v17 = vadd.f32 %v184_v14, %v175_v11 }
 0x14d   :  { %v181_v18 = vmul.f32 %v178_v16, %v178_v16  ;;  %v188_v19 = vmul.f32 0.7978846, %v186_v17 }
 0x14f   :  { %v183_v20 = vmul.f32 %v181_v18, %v178_v16  ;;  %292 = vtanh.f32 %v188_v19 }
 0x151   :  { %v185_v21 = vmul.f32 0.044715, %v183_v20 }
 0x153   :  { %v187_v22 = vadd.f32 %v185_v21, %v178_v16 }
 0x155   :  { %v293_v23 = vpop.eup %292  ;;  %v189_v24 = vmul.f32 0.7978846, %v187_v22 }
 0x156   :  { %v192_v25 = vadd.f32 1.0, %v293_v23 }
 0x157   :  { %294 = vtanh.f32 %v189_v24 }
 0x158   :  { %v194_v26 = vmul.f32 0.5, %v192_v25 }
 0x15a   :  { %v196_v27 = vmul.f32 %v194_v26, %v175_v11 }
 0x15c   :  { %234 = vmatmul.f32.vlgmr.msra.gmra.mxu2 %v196_v27 }
 0x15d   :  { %v295_v28 = vpop.eup %294 }
 0x15e   :  { %v193_v29 = vadd.f32 1.0, %v295_v28 }
 0x160   :  { %v195_v30 = vmul.f32 0.5, %v193_v29 }
 0x162   :  { %v197_v31 = vmul.f32 %v195_v30, %v178_v16 }
 0x164   :  { %237 = vmatmul.f32.gmra.mxu2 %v197_v31 }
 0x1df   :  { %v235_v33 = vpop.f32.mrf.mxu2 }
 0x1e0   :  { %v236_v34 = vadd.f32 %v287_v32, %v235_v33 }
 0x1e2   :  { %241 = vst [vmem:[#allocation8] sm:$0xff] %v236_v34 }
 0x1e7   :  { %v238_v35 = vpop.f32.mrf.mxu2 }
 0x1e8   :  { %v239_v36 = vadd.f32 %v287_v32, %v238_v35 }
 0x1ea   :  { %242 = vst [vmem:[#allocation8 + $0x8] sm:$0xff] %v239_v36 }
 0x1eb   :  { %255 = dma.vmem_to_hbm [thread:$0]  %s248_s23, 256, %s250_s26, [#allocation4], %s399_s9, %s399_s9, %s400_s10  }
 0x1ec   :  { %396 = dma.done.wait [#allocation4], 256  }
 0x1ed   :  { %397 = vsyncadd [#allocation4], 4294967040 }
 0x1ee   :  { %260 = vsyncpa [#allocation3], 1 }
 0x1ef   :  { %261 = vsyncpa [#allocation6], 1 }
 0x1f0   :  { %262 = vsyncpa [#allocation4], 1 }

</bundles_post_ra>
